<compile_context>
chip_gen: v5e
topology: v5e:2x2
jax: 0.10.0
libtpu: 0.0.40
codegen_flags: <defaults>
</compile_context>

<pallas_src>
import math
import jax
import jax.numpy as jnp
from jax import lax
from jax.experimental import pallas as pl
from jax.experimental.pallas import tpu as pltpu


def _round_up(n, m):
    return ((n + m - 1) // m) * m


def _critic_kernel(x_ref, w1t_ref, b1_ref, w2t_ref, b2_ref, w3_ref, b3_ref, o_ref):
    x = x_ref[...]                                              # (TM, IN) f32

    # Layer 1 as an NT matmul: (H1P, IN) . (TM, IN)^T -> (H1P, TM),
    # putting batch on the lane axis for the rest of the kernel.
    h1 = lax.dot_general(
        w1t_ref[...], x,
        dimension_numbers=(((1,), (1,)), ((), ())),
        preferred_element_type=jnp.float32)
    h1 = jnp.maximum(h1 + b1_ref[...], 0.0)                     # (H1P, TM)

    # Layer 2: (H2P, H1P) @ (H1P, TM) -> (H2P, TM)
    h2 = jnp.dot(w2t_ref[...], h1, preferred_element_type=jnp.float32)
    h2 = jnp.maximum(h2 + b2_ref[...], 0.0)                     # (H2P, TM)

    # Layer 3 (out_features == 1): VPU multiply + cross-sublane reduce (XLU).
    # Result stays lane-dense: (1, TM).
    out = jnp.sum(h2 * w3_ref[...], axis=0, keepdims=True) + b3_ref[...]
    o_ref[...] = out[None].astype(o_ref.dtype)                  # (1, 1, TM)


def init_critic_params(key, input_size):
    """Xavier-uniform weights (matching nn.init.xavier_uniform_), zero biases.

    Logical layout: wN is (in_features, out_features), bN is (1, out_features).
    """
    def xavier(key, fan_in, fan_out):
        bound = math.sqrt(6.0 / (fan_in + fan_out))
        return jax.random.uniform(
            key, (fan_in, fan_out), dtype=jnp.float32, minval=-bound, maxval=bound
        )

    k1, k2, k3 = jax.random.split(key, 3)
    return {
        "w1": xavier(k1, input_size, 20), "b1": jnp.zeros((1, 20), jnp.float32),
        "w2": xavier(k2, 20, 10),         "b2": jnp.zeros((1, 10), jnp.float32),
        "w3": xavier(k3, 10, 1),          "b3": jnp.zeros((1, 1), jnp.float32),
    }


def prepare_critic_params(params, *, h1_pad=128, h2_pad=128):
    """Transpose + zero-pad logical params into the kernel's VMEM-friendly layout.

    Kernel layout: w1t (H1P, IN), w2t (H2P, H1P), w3 column (H2P, 1),
    biases as (HkP, 1) columns, b3 as (1, 1).
    """
    f32 = jnp.float32
    w1, b1 = params["w1"], params["b1"]   # (IN, 20), (1, 20)
    w2, b2 = params["w2"], params["b2"]   # (20, 10), (1, 10)
    w3, b3 = params["w3"], params["b3"]   # (10, 1),  (1, 1)
    in_size, h1 = w1.shape
    h2 = w2.shape[1]

    w1t = jnp.zeros((h1_pad, in_size), f32).at[:h1, :].set(w1.T)
    b1c = jnp.zeros((h1_pad, 1), f32).at[:h1, 0].set(b1[0])
    w2t = jnp.zeros((h2_pad, h1_pad), f32).at[:h2, :h1].set(w2.T)
    b2c = jnp.zeros((h2_pad, 1), f32).at[:h2, 0].set(b2[0])
    w3c = jnp.zeros((h2_pad, 1), f32).at[:h2, :].set(w3)
    b3s = b3.reshape(1, 1).astype(f32)
    return {"w1t": w1t, "b1": b1c, "w2t": w2t, "b2": b2c, "w3": w3c, "b3": b3s}


def critic_forward(x, kparams, *, tm=1024):
    """x: (B, input_size) float32; kparams from prepare_critic_params."""
    B, in_size = x.shape
    w1t, b1 = kparams["w1t"], kparams["b1"]
    w2t, b2 = kparams["w2t"], kparams["b2"]
    w3c, b3 = kparams["w3"], kparams["b3"]
    h1p = w1t.shape[0]
    h2p = w2t.shape[0]

    # Batch tile: large for pipelining efficiency, clamped + 8-aligned for small B.
    TM = min(tm, _round_up(B, 8))
    n_tiles = pl.cdiv(B, TM)
    B_pad = n_tiles * TM
    if B_pad != B:
        x = jnp.pad(x, ((0, B_pad - B), (0, 0)))

    # Advisory cost for XLA scheduling around this call (logical, unpadded flops).
    flops = 2 * B_pad * (in_size * 20 + 20 * 10 + 10)
    bytes_accessed = (
        x.size * 4 + B_pad * 4
        + 4 * sum(int(p.size) for p in (w1t, b1, w2t, b2, w3c, b3))
    )

    out3 = pl.pallas_call(
        _critic_kernel,
        out_shape=jax.ShapeDtypeStruct((n_tiles, 1, TM), jnp.float32),
        grid=(n_tiles,),
        in_specs=[
            pl.BlockSpec((TM, in_size), lambda i: (i, 0)),    # x: tiled over batch
            pl.BlockSpec((h1p, in_size), lambda i: (0, 0)),   # weights/biases:
            pl.BlockSpec((h1p, 1), lambda i: (0, 0)),         #   resident in VMEM
            pl.BlockSpec((h2p, h1p), lambda i: (0, 0)),
            pl.BlockSpec((h2p, 1), lambda i: (0, 0)),
            pl.BlockSpec((h2p, 1), lambda i: (0, 0)),
            pl.BlockSpec((1, 1), lambda i: (0, 0)),
        ],
        out_specs=pl.BlockSpec((1, 1, TM), lambda i: (i, 0, 0)),  # lane-dense row
        compiler_params=pltpu.CompilerParams(
            dimension_semantics=("parallel",)),
        cost_estimate=pl.CostEstimate(
            flops=flops, transcendentals=0, bytes_accessed=bytes_accessed),
    )(x, w1t, b1, w2t, b2, w3c, b3)

    # (n_tiles, 1, TM) flattens in batch order; reshape back to (B, 1).
    return out3.reshape(B_pad, 1)[:B]


def critic_ref(x, params):
    """Pure-JAX reference (torch semantics) for correctness check."""
    h1 = jnp.maximum(x @ params["w1"] + params["b1"], 0.0)
    h2 = jnp.maximum(h1 @ params["w2"] + params["b2"], 0.0)
    return h2 @ params["w3"] + params["b3"]


if __name__ == "__main__":
    key = jax.random.PRNGKey(0)
    k_param, k_x = jax.random.split(key)

    batch = 8
    input_size = 32  # global observation size

    params = init_critic_params(k_param, input_size)
    kparams = prepare_critic_params(params)
    x = jax.random.normal(k_x, (batch, input_size), dtype=jnp.float32)

    out = critic_forward(x, kparams)
    out = jax.block_until_ready(out)

    ref = critic_ref(x, params)
    assert out.shape == (batch, 1), out.shape
    assert jnp.allclose(out, ref, atol=1e-5, rtol=1e-5), "mismatch vs reference"

    print("KERNEL_OK")
</pallas_src>

<mosaic_0001>
module attributes {stable_mosaic.version = 11 : i64} {
  func.func @_critic_kernel(%arg0: i32, %arg1: memref<8x32xf32, #tpu.memory_space<vmem>>, %arg2: memref<128x32xf32, #tpu.memory_space<vmem>>, %arg3: memref<128x1xf32, #tpu.memory_space<vmem>>, %arg4: memref<128x128xf32, #tpu.memory_space<vmem>>, %arg5: memref<128x1xf32, #tpu.memory_space<vmem>>, %arg6: memref<128x1xf32, #tpu.memory_space<vmem>>, %arg7: memref<1x1xf32, #tpu.memory_space<vmem>>, %arg8: memref<1x1x8xf32, #tpu.memory_space<vmem>>) attributes {dimension_semantics = [#tpu.dimension_semantics<parallel>], iteration_bounds = array<i64: 1>, scalar_prefetch = 0 : i64, scratch_operands = 0 : i64, tpu.core_type = #tpu.core_type<tc>, window_params = [{transform_indices = @transform_0, window_bounds = array<i64: 8, 32>}, {pipeline_mode = #tpu.pipeline_mode<synchronous>, transform_indices = @transform_1, window_bounds = array<i64: 128, 32>}, {pipeline_mode = #tpu.pipeline_mode<synchronous>, transform_indices = @transform_2, window_bounds = array<i64: 128, 1>}, {pipeline_mode = #tpu.pipeline_mode<synchronous>, transform_indices = @transform_3, window_bounds = array<i64: 128, 128>}, {pipeline_mode = #tpu.pipeline_mode<synchronous>, transform_indices = @transform_4, window_bounds = array<i64: 128, 1>}, {pipeline_mode = #tpu.pipeline_mode<synchronous>, transform_indices = @transform_5, window_bounds = array<i64: 128, 1>}, {pipeline_mode = #tpu.pipeline_mode<synchronous>, transform_indices = @transform_6, window_bounds = array<i64: 1, 1>}, {transform_indices = @transform_7, window_bounds = array<i64: 1, 1, 8>}]} {
    %c0 = arith.constant 0 : index
    %c0_0 = arith.constant 0 : index
    %0 = vector.load %arg1[%c0, %c0_0] : memref<8x32xf32, #tpu.memory_space<vmem>>, vector<8x32xf32>
    %c0_1 = arith.constant 0 : index
    %c0_2 = arith.constant 0 : index
    %1 = vector.load %arg2[%c0_1, %c0_2] : memref<128x32xf32, #tpu.memory_space<vmem>>, vector<128x32xf32>
    %cst = arith.constant dense<0.000000e+00> : vector<128x8xf32>
    %2 = tpu.matmul %1, %0, %cst {dimension_numbers = #tpu.dot_dimension_numbers<[1], [1], [0], [0], [0, 0, 1, 0], [], []>} : vector<128x32xf32>, vector<8x32xf32>, vector<128x8xf32> -> vector<128x8xf32>
    %c0_3 = arith.constant 0 : index
    %c0_4 = arith.constant 0 : index
    %3 = vector.load %arg3[%c0_3, %c0_4] : memref<128x1xf32, #tpu.memory_space<vmem>>, vector<128x1xf32>
    %4 = vector.broadcast %3 : vector<128x1xf32> to vector<128x8xf32>
    %5 = arith.addf %2, %4 : vector<128x8xf32>
    %cst_5 = arith.constant 0.000000e+00 : f32
    %6 = vector.broadcast %cst_5 : f32 to vector<128x8xf32>
    %7 = arith.maximumf %5, %6 : vector<128x8xf32>
    %c0_6 = arith.constant 0 : index
    %c0_7 = arith.constant 0 : index
    %8 = vector.load %arg4[%c0_6, %c0_7] : memref<128x128xf32, #tpu.memory_space<vmem>>, vector<128x128xf32>
    %cst_8 = arith.constant dense<0.000000e+00> : vector<128x8xf32>
    %9 = tpu.matmul %8, %7, %cst_8 {dimension_numbers = #tpu.dot_dimension_numbers<[1], [0], [0], [1], [0, 0, 1, 1], [], []>} : vector<128x128xf32>, vector<128x8xf32>, vector<128x8xf32> -> vector<128x8xf32>
    %c0_9 = arith.constant 0 : index
    %c0_10 = arith.constant 0 : index
    %10 = vector.load %arg5[%c0_9, %c0_10] : memref<128x1xf32, #tpu.memory_space<vmem>>, vector<128x1xf32>
    %11 = vector.broadcast %10 : vector<128x1xf32> to vector<128x8xf32>
    %12 = arith.addf %9, %11 : vector<128x8xf32>
    %cst_11 = arith.constant 0.000000e+00 : f32
    %13 = vector.broadcast %cst_11 : f32 to vector<128x8xf32>
    %14 = arith.maximumf %12, %13 : vector<128x8xf32>
    %c0_12 = arith.constant 0 : index
    %c0_13 = arith.constant 0 : index
    %15 = vector.load %arg6[%c0_12, %c0_13] : memref<128x1xf32, #tpu.memory_space<vmem>>, vector<128x1xf32>
    %16 = vector.broadcast %15 : vector<128x1xf32> to vector<128x8xf32>
    %17 = arith.mulf %14, %16 : vector<128x8xf32>
    %cst_14 = arith.constant dense<0.000000e+00> : vector<8xf32>
    %18 = vector.multi_reduction <add>, %17, %cst_14 [0] : vector<128x8xf32> to vector<8xf32>
    %19 = vector.shape_cast %18 : vector<8xf32> to vector<1x8xf32>
    %c0_15 = arith.constant 0 : index
    %c0_16 = arith.constant 0 : index
    %20 = vector.load %arg7[%c0_15, %c0_16] : memref<1x1xf32, #tpu.memory_space<vmem>>, vector<1x1xf32>
    %21 = vector.broadcast %20 : vector<1x1xf32> to vector<1x8xf32>
    %22 = arith.addf %19, %21 : vector<1x8xf32>
    %23 = vector.shape_cast %22 : vector<1x8xf32> to vector<1x1x8xf32>
    %c0_17 = arith.constant 0 : index
    %c0_18 = arith.constant 0 : index
    %c0_19 = arith.constant 0 : index
    %24 = vector.load %arg8[%c0_17, %c0_18, %c0_19] : memref<1x1x8xf32, #tpu.memory_space<vmem>>, vector<1x1x8xf32>
    tpu.vector_store %arg8[%c0_17, %c0_18, %c0_19], %23 {strides = array<i32>} : memref<1x1x8xf32, #tpu.memory_space<vmem>>, vector<1x1x8xf32>,
    return
  }
  func.func @transform_0(%arg0: i32) -> (i32, i32) {
    %c0_i32 = arith.constant 0 : i32
    %c0_i32_0 = arith.constant 0 : i32
    return %arg0, %c0_i32 : i32, i32
  }
  func.func @transform_1(%arg0: i32) -> (i32, i32) {
    %c0_i32 = arith.constant 0 : i32
    %c0_i32_0 = arith.constant 0 : i32
    %c0_i32_1 = arith.constant 0 : i32
    return %c0_i32, %c0_i32_0 : i32, i32
  }
  func.func @transform_2(%arg0: i32) -> (i32, i32) {
    %c0_i32 = arith.constant 0 : i32
    %c0_i32_0 = arith.constant 0 : i32
    %c0_i32_1 = arith.constant 0 : i32
    return %c0_i32, %c0_i32_0 : i32, i32
  }
  func.func @transform_3(%arg0: i32) -> (i32, i32) {
    %c0_i32 = arith.constant 0 : i32
    %c0_i32_0 = arith.constant 0 : i32
    %c0_i32_1 = arith.constant 0 : i32
    return %c0_i32, %c0_i32_0 : i32, i32
  }
  func.func @transform_4(%arg0: i32) -> (i32, i32) {
    %c0_i32 = arith.constant 0 : i32
    %c0_i32_0 = arith.constant 0 : i32
    %c0_i32_1 = arith.constant 0 : i32
    return %c0_i32, %c0_i32_0 : i32, i32
  }
  func.func @transform_5(%arg0: i32) -> (i32, i32) {
    %c0_i32 = arith.constant 0 : i32
    %c0_i32_0 = arith.constant 0 : i32
    %c0_i32_1 = arith.constant 0 : i32
    return %c0_i32, %c0_i32_0 : i32, i32
  }
  func.func @transform_6(%arg0: i32) -> (i32, i32) {
    %c0_i32 = arith.constant 0 : i32
    %c0_i32_0 = arith.constant 0 : i32
    %c0_i32_1 = arith.constant 0 : i32
    return %c0_i32, %c0_i32_0 : i32, i32
  }
  func.func @transform_7(%arg0: i32) -> (i32, i32, i32) {
    %c0_i32 = arith.constant 0 : i32
    %c0_i32_0 = arith.constant 0 : i32
    %c0_i32_1 = arith.constant 0 : i32
    return %arg0, %c0_i32, %c0_i32_0 : i32, i32, i32
  }
}

</mosaic_0001>

<bundles_post_ra>
// kernel: tpu_custom_call.1
= control target key start
LH: loop header
LB: loop body
LE: loop exit
PB: predicated region body
PF: predicated region fallthrough
CT: control target
= control target key end

     0   :  { %s1086_s0 = inlined_call_operand.vmem [shape: f32[8,32], index: 0, kind: input, shape index: {}]   ;;  %s1087_s1 = inlined_call_operand.vmem [shape: f32[128,32], index: 1, kind: input, shape index: {}]   ;;  %s1088_s2 = inlined_call_operand.vmem [shape: f32[128,1], index: 2, kind: input, shape index: {}]   ;;  %s1089_s3 = inlined_call_operand.vmem [shape: f32[128,128], index: 3, kind: input, shape index: {}]   ;;  %s1090_s4 = inlined_call_operand.vmem [shape: f32[128,1], index: 4, kind: input, shape index: {}]   ;;  %s1091_s5 = inlined_call_operand.vmem [shape: f32[128,1], index: 5, kind: input, shape index: {}]   ;;  %s1092_s6 = inlined_call_operand.<no memory space> [shape: f32[1,1], index: 6, kind: input, shape index: {}]   ;;  %s1093_s7 = inlined_call_operand.hbm [shape: f32[1,1,8], index: 7, kind: output, shape index: {}]  }
   0x1   :  { %v12_v0 = vstv %s1092_s6 }
   0x2   :  { %13 = vst [vmem:[#allocation2] sm:$0x1] %v12_v0 }
   0x3   :  { %v29_v1 = vld [vmem:[%s1086_s0] sm:$0xff]  ;;  %vm142_vm0 = vcmask 261120   ;;  %v61_v2 = vld [vmem:[%s1088_s2 + $0x78] sm:$0xff]  ;;  %v725_v3 = vmov 0   ;;  %v59_v4 = vld [vmem:[%s1088_s2 + $0x68] sm:$0xff] }
   0x4   :  { %698 = vset.pattern.permute.xlu2 %v725_v3  ;;  %697 = vset.pattern.permute.xlu1 %v725_v3  ;;  %v57_v5 = vld [vmem:[%s1088_s2 + $0x58] sm:$0xff]  ;;  %v30_v6 = vld [vmem:[%s1087_s1] sm:$0xff]  ;;  %v40_v7 = vld [vmem:[%s1087_s1 + $0x50] sm:$0xff] }
   0x5   :  { %696 = vset.pattern.permute.xlu0 %v725_v3  ;;  %644 = vmatpush.xpose.msk.msra.mxu0 %vm142_vm0, %v29_v1  ;;  %v60_v8 = vld [vmem:[%s1088_s2 + $0x70] sm:$0xff]  ;;  %v58_v9 = vld [vmem:[%s1088_s2 + $0x60] sm:$0xff] }
   0x6   :  { %661 = vmatpush.xpose.msk.msra.mxu3 %vm142_vm0, %v29_v1  ;;  %139 = vperm.xlu0 %696, %v61_v2   ;;  %v56_v10 = vld [vmem:[%s1088_s2 + $0x50] sm:$0xff] }
   0x7   :  { %129 = vperm.xlu1 %697, %v59_v4   ;;  %119 = vperm.xlu2 %698, %v57_v5  }
   0x8   :  { %645 = vmatmul.msk.f32.vlgmr.msra.gmra.mxu0 %vm142_vm0, %v30_v6 }
   0x9   :  { %655 = vmatmul.msk.f32.vlgmr.msra.gmra.mxu3 %vm142_vm0, %v40_v7 }
   0xa   :  { %14 = vsyncpa [#allocation4], 0  ;;  %v31_v11 = vld [vmem:[%s1087_s1 + $0x8] sm:$0xff]  ;;  %v41_v12 = vld [vmem:[%s1087_s1 + $0x58] sm:$0xff]  ;;  %vm580_vm1 = vcmask 64512   ;;  %s635_s29 = sshll.u32 %s1093_s7, 4  ;;  %s636_s29 = int_to_ptr.hbm [resolvable:$true] %s635_s29 }
   0xb   :  { %v55_v13 = vld [vmem:[%s1088_s2 + $0x48] sm:$0xff]  ;;  %v54_v14 = vld [vmem:[%s1088_s2 + $0x40] sm:$0xff]  ;;  %v53_v15 = vld [vmem:[%s1088_s2 + $0x38] sm:$0xff]  ;;  %vm626_vm2 = vcmask 57344  }
   0xc   :  { %v32_v16 = vld [vmem:[%s1087_s1 + $0x10] sm:$0xff]  ;;  %v42_v17 = vld [vmem:[%s1087_s1 + $0x60] sm:$0xff]  ;;  %v51_v19 = vld [vmem:[%s1088_s2 + $0x28] sm:$0xff] }
   0xd   :  { %v52_v18 = vld [vmem:[%s1088_s2 + $0x30] sm:$0xff]  ;;  %v50_v20 = vld [vmem:[%s1088_s2 + $0x20] sm:$0xff]  ;;  %v33_v21 = vld [vmem:[%s1087_s1 + $0x18] sm:$0xff] }
   0xe   :  { %134 = vperm.xlu0 %696, %v60_v8   ;;  %v43_v22 = vld [vmem:[%s1087_s1 + $0x68] sm:$0xff]  ;;  %v49_v23 = vld [vmem:[%s1088_s2 + $0x18] sm:$0xff]  ;;  %v48_v24 = vld [vmem:[%s1088_s2 + $0x10] sm:$0xff] }
   0xf   :  { %124 = vperm.xlu1 %697, %v58_v9   ;;  %114 = vperm.xlu2 %698, %v56_v10   ;;  %v47_v25 = vld [vmem:[%s1088_s2 + $0x8] sm:$0xff]  ;;  %v34_v26 = vld [vmem:[%s1087_s1 + $0x20] sm:$0xff]  ;;  %v44_v27 = vld [vmem:[%s1087_s1 + $0x70] sm:$0xff] }
  0x10   :  { %646 = vmatmul.msk.f32.gmra.mxu0 %vm142_vm0, %v31_v11  ;;  %v46_v28 = vld [vmem:[%s1088_s2] sm:$0xff]  ;;  %v292_v30 = vld [vmem:[%s1090_s4 + $0x8] sm:$0xff]  ;;  %v45_v32 = vld [vmem:[%s1087_s1 + $0x78] sm:$0xff] }
  0x11   :  { %656 = vmatmul.msk.f32.gmra.mxu3 %vm142_vm0, %v41_v12  ;;  %v291_v29 = vld [vmem:[%s1090_s4] sm:$0xff]  ;;  %v35_v31 = vld [vmem:[%s1087_s1 + $0x28] sm:$0xff]  ;;  %v293_v33 = vld [vmem:[%s1090_s4 + $0x10] sm:$0xff] }
  0x12   :  { %v294_v34 = vld [vmem:[%s1090_s4 + $0x18] sm:$0xff]  ;;  %v295_v35 = vld [vmem:[%s1090_s4 + $0x20] sm:$0xff]  ;;  %v36_v36 = vld [vmem:[%s1087_s1 + $0x30] sm:$0xff] }
  0x13   :  { %v296_v37 = vld [vmem:[%s1090_s4 + $0x28] sm:$0xff]  ;;  %v297_v38 = vld [vmem:[%s1090_s4 + $0x30] sm:$0xff]  ;;  %v298_v39 = vld [vmem:[%s1090_s4 + $0x38] sm:$0xff] }
  0x14   :  { %v37_v40 = vld [vmem:[%s1087_s1 + $0x38] sm:$0xff]  ;;  %v299_v41 = vld [vmem:[%s1090_s4 + $0x40] sm:$0xff]  ;;  %v300_v42 = vld [vmem:[%s1090_s4 + $0x48] sm:$0xff] }
  0x15   :  { %v301_v43 = vld [vmem:[%s1090_s4 + $0x50] sm:$0xff]  ;;  %v38_v44 = vld [vmem:[%s1087_s1 + $0x40] sm:$0xff]  ;;  %v302_v45 = vld [vmem:[%s1090_s4 + $0x58] sm:$0xff] }
  0x16   :  { %109 = vperm.xlu0 %696, %v55_v13   ;;  %v303_v46 = vld [vmem:[%s1090_s4 + $0x60] sm:$0xff]  ;;  %v304_v47 = vld [vmem:[%s1090_s4 + $0x68] sm:$0xff]  ;;  %v305_v49 = vld [vmem:[%s1090_s4 + $0x70] sm:$0xff] }
  0x17   :  { %104 = vperm.xlu1 %697, %v54_v14   ;;  %99 = vperm.xlu2 %698, %v53_v15   ;;  %v39_v48 = vld [vmem:[%s1087_s1 + $0x48] sm:$0xff]  ;;  %v306_v50 = vld [vmem:[%s1090_s4 + $0x78] sm:$0xff]  ;;  %v468_v51 = vld [vmem:[%s1091_s5] sm:$0xff] }
  0x18   :  { %647 = vmatmul.msk.f32.gmra.mxu0 %vm142_vm0, %v32_v16  ;;  %v469_v52 = vld [vmem:[%s1091_s5 + $0x8] sm:$0xff]  ;;  %v470_v53 = vld [vmem:[%s1091_s5 + $0x10] sm:$0xff]  ;;  %v471_v54 = vld [vmem:[%s1091_s5 + $0x18] sm:$0xff] }
  0x19   :  { %657 = vmatmul.msk.f32.gmra.mxu3 %vm142_vm0, %v42_v17  ;;  %v472_v55 = vld [vmem:[%s1091_s5 + $0x20] sm:$0xff]  ;;  %v473_v56 = vld [vmem:[%s1091_s5 + $0x28] sm:$0xff]  ;;  %v474_v57 = vld [vmem:[%s1091_s5 + $0x30] sm:$0xff] }
  0x1a   :  { %v475_v58 = vld [vmem:[%s1091_s5 + $0x38] sm:$0xff]  ;;  %v476_v59 = vld [vmem:[%s1091_s5 + $0x40] sm:$0xff]  ;;  %v477_v60 = vld [vmem:[%s1091_s5 + $0x48] sm:$0xff] }
  0x1b   :  { %v478_v61 = vld [vmem:[%s1091_s5 + $0x50] sm:$0xff]  ;;  %v479_v62 = vld [vmem:[%s1091_s5 + $0x58] sm:$0xff]  ;;  %v480_v63 = vld [vmem:[%s1091_s5 + $0x60] sm:$0xff] }
  0x1c   :  { %v481_v0 = vld [vmem:[%s1091_s5 + $0x68] sm:$0xff]  ;;  %v482_v1 = vld [vmem:[%s1091_s5 + $0x70] sm:$0xff]  ;;  %v483_v2 = vld [vmem:[%s1091_s5 + $0x78] sm:$0xff] }
  0x1d   :  { %v618_v3 = vld [vmem:[#allocation2] sm:$0x1] }
  0x1e   :  { %94 = vperm.xlu0 %696, %v52_v18  }
  0x1f   :  { %89 = vperm.xlu1 %697, %v51_v19   ;;  %84 = vperm.xlu2 %698, %v50_v20  }
  0x20   :  { %648 = vmatmul.msk.f32.gmra.mxu0 %vm142_vm0, %v33_v21 }
  0x21   :  { %658 = vmatmul.msk.f32.gmra.mxu3 %vm142_vm0, %v43_v22 }
  0x26   :  { %79 = vperm.xlu0 %696, %v49_v23  }
  0x27   :  { %74 = vperm.xlu1 %697, %v48_v24   ;;  %69 = vperm.xlu2 %698, %v47_v25  }
  0x28   :  { %649 = vmatmul.msk.f32.gmra.mxu0 %vm142_vm0, %v34_v26 }
  0x29   :  { %659 = vmatmul.msk.f32.gmra.mxu3 %vm142_vm0, %v44_v27 }
  0x2e   :  { %64 = vperm.xlu0 %696, %v46_v28  }
  0x2f   :  { %309 = vperm.xlu1 %697, %v291_v29   ;;  %314 = vperm.xlu2 %698, %v292_v30  }
  0x30   :  { %650 = vmatmul.msk.f32.gmra.mxu0 %vm142_vm0, %v35_v31 }
  0x31   :  { %660 = vmatmul.msk.f32.gmra.mxu3 %vm142_vm0, %v45_v32 }
  0x36   :  { %319 = vperm.xlu0 %696, %v293_v33  }
  0x37   :  { %324 = vperm.xlu1 %697, %v294_v34   ;;  %329 = vperm.xlu2 %698, %v295_v35  }
  0x38   :  { %651 = vmatmul.msk.f32.gmra.mxu0 %vm142_vm0, %v36_v36 }
  0x3e   :  { %334 = vperm.xlu0 %696, %v296_v37  }
  0x3f   :  { %339 = vperm.xlu1 %697, %v297_v38   ;;  %344 = vperm.xlu2 %698, %v298_v39  }
  0x40   :  { %652 = vmatmul.msk.f32.gmra.mxu0 %vm142_vm0, %v37_v40 }
  0x46   :  { %349 = vperm.xlu0 %696, %v299_v41  }
  0x47   :  { %354 = vperm.xlu1 %697, %v300_v42   ;;  %359 = vperm.xlu2 %698, %v301_v43  }
  0x48   :  { %653 = vmatmul.msk.f32.gmra.mxu0 %vm142_vm0, %v38_v44 }
  0x4e   :  { %364 = vperm.xlu0 %696, %v302_v45  }
  0x4f   :  { %369 = vperm.xlu1 %697, %v303_v46   ;;  %374 = vperm.xlu2 %698, %v304_v47  }
  0x50   :  { %654 = vmatmul.msk.f32.gmra.mxu0 %vm142_vm0, %v39_v48 }
  0x56   :  { %379 = vperm.xlu0 %696, %v305_v49  }
  0x57   :  { %384 = vperm.xlu1 %697, %v306_v50   ;;  %486 = vperm.xlu2 %698, %v468_v51  }
  0x5e   :  { %491 = vperm.xlu0 %696, %v469_v52  }
  0x5f   :  { %496 = vperm.xlu1 %697, %v470_v53   ;;  %501 = vperm.xlu2 %698, %v471_v54  }
  0x61   :  { %v120_v17 = vpop.permute.xlu2 %119 }
  0x66   :  { %506 = vperm.xlu0 %696, %v472_v55  }
  0x67   :  { %511 = vperm.xlu1 %697, %v473_v56   ;;  %516 = vperm.xlu2 %698, %v474_v57  }
  0x69   :  { %v115_v30 = vpop.permute.xlu2 %114 }
  0x6e   :  { %521 = vperm.xlu0 %696, %v475_v58  }
  0x6f   :  { %526 = vperm.xlu1 %697, %v476_v59   ;;  %531 = vperm.xlu2 %698, %v477_v60  }
  0x71   :  { %v100_v39 = vpop.permute.xlu2 %99 }
  0x76   :  { %536 = vperm.xlu0 %696, %v478_v61  }
  0x77   :  { %541 = vperm.xlu1 %697, %v479_v62   ;;  %546 = vperm.xlu2 %698, %v480_v63  }
  0x78   :  { %v140_v13 = vpop.permute.xlu0 %139 }
  0x79   :  { %v130_v16 = vpop.permute.xlu1 %129  ;;  %v85_v47 = vpop.permute.xlu2 %84 }
  0x7e   :  { %551 = vperm.xlu0 %696, %v481_v0  }
  0x7f   :  { %556 = vperm.xlu1 %697, %v482_v1   ;;  %561 = vperm.xlu2 %698, %v483_v2  }
  0x80   :  { %v135_v18 = vpop.permute.xlu0 %134 }
  0x81   :  { %v125_v26 = vpop.permute.xlu1 %124  ;;  %v70_v60 = vpop.permute.xlu2 %69 }
  0x85   :  { %v983_v4 = vpop.f32.mrf.mxu0 }
  0x86   :  { %621 = vperm.xlu0 %696, %v618_v3  }
  0x88   :  { %v110_v31 = vpop.permute.xlu0 %109 }
  0x89   :  { %v105_v37 = vpop.permute.xlu1 %104 }
  0x8c   :  { %v241_v5 = vpop.f32.mrf.mxu3 }
  0x8d   :  { %v985_v6 = vpop.f32.mrf.mxu0  ;;  %v242_v32 = vadd.f32 %v241_v5, %v115_v30  ;;  %v275_v5 = vld [vmem:[%s1089_s3] sm:$0xff] }
  0x8e   :  { %v215_v62 = vadd.f32 %v985_v6, %v70_v60  ;;  %v282_v6 = vld [vmem:[%s1089_s3 + $0x38] sm:$0xff] }
  0x8f   :  { %v269_v36 = vmax.f32 %v242_v32, 0.0 }
  0x90   :  { %v95_v40 = vpop.permute.xlu0 %94  ;;  %v260_v2 = vmax.f32 %v215_v62, 0.0 }
  0x91   :  { %v90_v41 = vpop.permute.xlu1 %89 }
  0x94   :  { %v244_v7 = vpop.f32.mrf.mxu3 }
  0x95   :  { %v987_v8 = vpop.f32.mrf.mxu0  ;;  %v245_v28 = vadd.f32 %v244_v7, %v120_v17  ;;  %v276_v7 = vld [vmem:[%s1089_s3 + $0x8] sm:$0xff]  ;;  %v287_v17 = vld [vmem:[%s1089_s3 + $0x60] sm:$0xff] }
  0x97   :  { %v270_v35 = vmax.f32 %v245_v28, 0.0 }
  0x98   :  { %v80_v48 = vpop.permute.xlu0 %79 }
  0x99   :  { %v75_v55 = vpop.permute.xlu1 %74 }
  0x9a   :  { %v218_v58 = vadd.f32 %v987_v8, %v75_v55  ;;  %v283_v8 = vld [vmem:[%s1089_s3 + $0x40] sm:$0xff] }
  0x9c   :  { %v247_v9 = vpop.f32.mrf.mxu3  ;;  %v261_v0 = vmax.f32 %v218_v58, 0.0 }
  0x9d   :  { %v989_v10 = vpop.f32.mrf.mxu0  ;;  %v248_v27 = vadd.f32 %v247_v9, %v125_v26  ;;  %v290_v9 = vld [vmem:[%s1089_s3 + $0x78] sm:$0xff] }
  0x9e   :  { %v221_v56 = vadd.f32 %v989_v10, %v80_v48  ;;  %v277_v10 = vld [vmem:[%s1089_s3 + $0x10] sm:$0xff] }
  0x9f   :  { %v271_v33 = vmax.f32 %v248_v27, 0.0 }
  0xa0   :  { %v65_v61 = vpop.permute.xlu0 %64  ;;  %v262_v63 = vmax.f32 %v221_v56, 0.0 }
  0xa1   :  { %v212_v1 = vadd.f32 %v983_v4, %v65_v61  ;;  %v289_v4 = vld [vmem:[%s1089_s3 + $0x70] sm:$0xff] }
  0xa3   :  { %v259_v3 = vmax.f32 %v212_v1, 0.0 }
  0xa4   :  { %v250_v11 = vpop.f32.mrf.mxu3 }
  0xa5   :  { %v991_v12 = vpop.f32.mrf.mxu0  ;;  %v251_v23 = vadd.f32 %v250_v11, %v130_v16  ;;  %v284_v11 = vld [vmem:[%s1089_s3 + $0x48] sm:$0xff] }
  0xa6   :  { %v224_v53 = vadd.f32 %v991_v12, %v85_v47  ;;  %v278_v12 = vld [vmem:[%s1089_s3 + $0x18] sm:$0xff]  ;;  %v280_v16 = vld [vmem:[%s1089_s3 + $0x28] sm:$0xff] }
  0xa7   :  { %v272_v29 = vmax.f32 %v251_v23, 0.0 }
  0xa8   :  { %v263_v59 = vmax.f32 %v224_v53, 0.0 }
  0xac   :  { %v253_v14 = vpop.f32.mrf.mxu3 }
  0xad   :  { %v226_v15 = vpop.f32.mrf.mxu0  ;;  %v254_v19 = vadd.f32 %v253_v14, %v135_v18  ;;  %v279_v14 = vld [vmem:[%s1089_s3 + $0x20] sm:$0xff]  ;;  %v281_v18 = vld [vmem:[%s1089_s3 + $0x30] sm:$0xff] }
  0xae   :  { %v227_v51 = vadd.f32 %v226_v15, %v90_v41  ;;  %v286_v15 = vld [vmem:[%s1089_s3 + $0x58] sm:$0xff] }
  0xaf   :  { %v273_v24 = vmax.f32 %v254_v19, 0.0  ;;  %v288_v19 = vld [vmem:[%s1089_s3 + $0x68] sm:$0xff] }
  0xb0   :  { %v264_v57 = vmax.f32 %v227_v51, 0.0 }
  0xb4   :  { %v256_v20 = vpop.f32.mrf.mxu3 }
  0xb5   :  { %v257_v21 = vadd.f32 %v256_v20, %v140_v13  ;;  %v229_v22 = vpop.f32.mrf.mxu0  ;;  %v285_v13 = vld [vmem:[%s1089_s3 + $0x50] sm:$0xff]  ;;  %v310_v20 = vpop.permute.xlu1 %309  ;;  %s726_s3 = smov [#allocation3]  }
  0xb6   :  { %v230_v49 = vadd.f32 %v229_v22, %v95_v40  ;;  %v320_v22 = vpop.permute.xlu0 %319  ;;  %s633_s27 = sshll.u32 %s726_s3, 4  ;;  %s634_s27 = int_to_ptr.vmem [resolvable:$true] %s633_s27 }
  0xb7   :  { %v274_v25 = vmax.f32 %v257_v21, 0.0  ;;  %v315_v21 = vpop.permute.xlu2 %314 }
  0xb8   :  { %v265_v54 = vmax.f32 %v230_v49, 0.0 }
  0xb9   :  { %387 = vmatpush.msra.mxu1 %v274_v25  ;;  %662 = vmatpush.msra.mxu2 %v274_v25 }
  0xba   :  { %663 = vmatpush.msrb.mxu3 %v274_v25 }
  0xbb   :  { %388 = vmatpush.msra.mxu1 %v273_v24  ;;  %664 = vmatpush.msra.mxu2 %v273_v24 }
  0xbc   :  { %665 = vmatpush.msrb.mxu3 %v273_v24 }
  0xbd   :  { %389 = vmatpush.msra.mxu1 %v272_v29  ;;  %666 = vmatpush.msra.mxu2 %v272_v29  ;;  %v232_v34 = vpop.f32.mrf.mxu0  ;;  %v325_v23 = vpop.permute.xlu1 %324 }
  0xbe   :  { %667 = vmatpush.msrb.mxu3 %v272_v29  ;;  %v233_v45 = vadd.f32 %v232_v34, %v100_v39  ;;  %v335_v25 = vpop.permute.xlu0 %334 }
  0xbf   :  { %390 = vmatpush.msra.mxu1 %v271_v33  ;;  %668 = vmatpush.msra.mxu2 %v271_v33  ;;  %v330_v24 = vpop.permute.xlu2 %329 }
  0xc0   :  { %669 = vmatpush.msrb.mxu3 %v271_v33  ;;  %v266_v52 = vmax.f32 %v233_v45, 0.0 }
  0xc1   :  { %391 = vmatpush.msra.mxu1 %v270_v35  ;;  %670 = vmatpush.msra.mxu2 %v270_v35 }
  0xc2   :  { %671 = vmatpush.msrb.mxu3 %v270_v35 }
  0xc3   :  { %392 = vmatpush.msra.mxu1 %v269_v36  ;;  %672 = vmatpush.msra.mxu2 %v269_v36 }
  0xc4   :  { %673 = vmatpush.msrb.mxu3 %v269_v36 }
  0xc5   :  { %v235_v38 = vpop.f32.mrf.mxu0  ;;  %v1046_v26 = vpop.permute.xlu1 %339 }
  0xc6   :  { %v236_v43 = vadd.f32 %v235_v38, %v105_v37  ;;  %v350_v28 = vpop.permute.xlu0 %349 }
  0xc7   :  { %v345_v27 = vpop.permute.xlu2 %344 }
  0xc8   :  { %v267_v50 = vmax.f32 %v236_v43, 0.0 }
  0xcd   :  { %v238_v42 = vpop.f32.mrf.mxu0  ;;  %v355_v29 = vpop.permute.xlu1 %354 }
  0xce   :  { %v239_v44 = vadd.f32 %v238_v42, %v110_v31  ;;  %v1050_v32 = vpop.permute.xlu0 %364 }
  0xcf   :  { %v1048_v30 = vpop.permute.xlu2 %359 }
  0xd0   :  { %v268_v46 = vmax.f32 %v239_v44, 0.0 }
  0xd2   :  { %393 = vmatpush.msra.mxu1 %v268_v46  ;;  %674 = vmatpush.msra.mxu2 %v268_v46 }
  0xd3   :  { %675 = vmatpush.msrb.mxu3 %v268_v46 }
  0xd4   :  { %394 = vmatpush.msra.mxu1 %v267_v50  ;;  %676 = vmatpush.msra.mxu2 %v267_v50 }
  0xd5   :  { %677 = vmatpush.msrb.mxu3 %v267_v50  ;;  %v1052_v33 = vpop.permute.xlu1 %369 }
  0xd6   :  { %395 = vmatpush.msra.mxu1 %v266_v52  ;;  %678 = vmatpush.msra.mxu2 %v266_v52  ;;  %v1056_v37 = vpop.permute.xlu0 %379 }
  0xd7   :  { %679 = vmatpush.msrb.mxu3 %v266_v52  ;;  %v1054_v34 = vpop.permute.xlu2 %374 }
  0xd8   :  { %396 = vmatpush.msra.mxu1 %v265_v54  ;;  %680 = vmatpush.msra.mxu2 %v265_v54 }
  0xd9   :  { %681 = vmatpush.msrb.mxu3 %v265_v54 }
  0xda   :  { %397 = vmatpush.msra.mxu1 %v264_v57  ;;  %682 = vmatpush.msra.mxu2 %v264_v57 }
  0xdb   :  { %683 = vmatpush.msrb.mxu3 %v264_v57 }
  0xdc   :  { %398 = vmatpush.msra.mxu1 %v263_v59  ;;  %684 = vmatpush.msra.mxu2 %v263_v59 }
  0xdd   :  { %685 = vmatpush.msrb.mxu3 %v263_v59  ;;  %v1058_v39 = vpop.permute.xlu1 %384 }
  0xde   :  { %399 = vmatpush.msra.mxu1 %v262_v63  ;;  %686 = vmatpush.msra.mxu2 %v262_v63  ;;  %v492_v43 = vpop.permute.xlu0 %491 }
  0xdf   :  { %687 = vmatpush.msrb.mxu3 %v262_v63  ;;  %v487_v41 = vpop.permute.xlu2 %486 }
  0xe0   :  { %400 = vmatpush.msra.mxu1 %v261_v0  ;;  %688 = vmatpush.msra.mxu2 %v261_v0 }
  0xe1   :  { %689 = vmatpush.msrb.mxu3 %v261_v0 }
  0xe2   :  { %401 = vmatpush.msra.mxu1 %v260_v2  ;;  %690 = vmatpush.msra.mxu2 %v260_v2 }
  0xe3   :  { %691 = vmatpush.msrb.mxu3 %v260_v2 }
  0xe4   :  { %402 = vmatpush.msra.mxu1 %v259_v3  ;;  %692 = vmatpush.msra.mxu2 %v259_v3 }
  0xe5   :  { %693 = vmatpush.msrb.mxu3 %v259_v3  ;;  %403 = vmatmul.f32.vlgmr.msra.gmra.mxu1 %v275_v5  ;;  %v497_v45 = vpop.permute.xlu1 %496 }
  0xe6   :  { %424 = vmatmul.f32.vlgmr.msra.gmra.mxu2 %v282_v6  ;;  %445 = vmatmul.f32.vlgmr.msrb.gmra.mxu3 %v289_v4  ;;  %v507_v52 = vpop.permute.xlu0 %506 }
  0xe7   :  { %v502_v46 = vpop.permute.xlu2 %501 }
  0xed   :  { %406 = vmatmul.f32.gmra.mxu1 %v276_v7  ;;  %v512_v55 = vpop.permute.xlu1 %511 }
  0xee   :  { %427 = vmatmul.f32.gmra.mxu2 %v283_v8  ;;  %448 = vmatmul.f32.gmra.mxu3 %v290_v9  ;;  %v522_v7 = vpop.permute.xlu0 %521 }
  0xef   :  { %v517_v56 = vpop.permute.xlu2 %516 }
  0xf5   :  { %409 = vmatmul.f32.gmra.mxu1 %v277_v10 }
  0xf6   :  { %430 = vmatmul.f32.gmra.mxu2 %v284_v11 }
  0xfd   :  { %412 = vmatmul.f32.gmra.mxu1 %v278_v12  ;;  %v527_v12 = vpop.permute.xlu1 %526 }
  0xfe   :  { %433 = vmatmul.f32.gmra.mxu2 %v285_v13 }
 0x105   :  { %415 = vmatmul.f32.gmra.mxu1 %v279_v14  ;;  %v532_v14 = vpop.permute.xlu2 %531 }
 0x106   :  { %436 = vmatmul.f32.gmra.mxu2 %v286_v15 }
 0x10d   :  { %418 = vmatmul.f32.gmra.mxu1 %v280_v16 }
 0x10e   :  { %439 = vmatmul.f32.gmra.mxu2 %v287_v17 }
 0x115   :  { %421 = vmatmul.f32.gmra.mxu1 %v281_v18 }
 0x116   :  { %442 = vmatmul.f32.gmra.mxu2 %v288_v19 }
 0x162   :  { %v404_v31 = vpop.f32.mrf.mxu1 }
 0x163   :  { %v405_v50 = vadd.f32 %v404_v31, %v310_v20 }
 0x165   :  { %v452_v57 = vmax.f32 %v405_v50, 0.0  ;;  %v542_v50 = vpop.permute.xlu1 %541 }
 0x167   :  { %v564_v0 = vmul.f32 %v487_v41, %v452_v57 }
 0x169   :  { %v425_v35 = vpop.f32.mrf.mxu2  ;;  %v581_v8 = vsel %vm580_vm1, %v564_v0, 0.0  ;;  %v446_v19 = vpop.f32.mrf.mxu3 }
 0x16a   :  { %v407_v36 = vpop.f32.mrf.mxu1  ;;  %v426_v9 = vadd.f32 %v425_v35, %v345_v27 }
 0x16b   :  { %v408_v47 = vadd.f32 %v407_v36, %v315_v21 }
 0x16d   :  { %v453_v53 = vmax.f32 %v408_v47, 0.0 }
 0x16f   :  { %v565_v60 = vmul.f32 %v492_v43, %v453_v53 }
 0x171   :  { %v428_v38 = vpop.f32.mrf.mxu2  ;;  %v582_v5 = vsel %vm580_vm1, %v565_v60, 0.0 }
 0x172   :  { %v410_v40 = vpop.f32.mrf.mxu1  ;;  %v583_v13 = vadd.f32 %v582_v5, %v581_v8  ;;  %v429_v15 = vadd.f32 %v428_v38, %v350_v28 }
 0x173   :  { %v411_v51 = vadd.f32 %v410_v40, %v320_v22  ;;  %v459_v22 = vmax.f32 %v426_v9, 0.0 }
 0x174   :  { %v460_v31 = vmax.f32 %v429_v15, 0.0 }
 0x175   :  { %v454_v58 = vmax.f32 %v411_v51, 0.0  ;;  %v571_v40 = vmul.f32 %v522_v7, %v459_v22  ;;  %v557_v7 = vpop.permute.xlu1 %556 }
 0x177   :  { %v566_v1 = vmul.f32 %v497_v45, %v454_v58  ;;  %v537_v45 = vpop.permute.xlu0 %536 }
 0x179   :  { %v431_v42 = vpop.f32.mrf.mxu2  ;;  %v584_v10 = vsel %vm580_vm1, %v566_v1, 0.0 }
 0x17a   :  { %v413_v44 = vpop.f32.mrf.mxu1  ;;  %v585_v20 = vadd.f32 %v584_v10, %v583_v13 }
 0x17b   :  { %v414_v54 = vadd.f32 %v413_v44, %v325_v23  ;;  %v432_v23 = vadd.f32 %v431_v42, %v355_v29  ;;  %v572_v29 = vmul.f32 %v527_v12, %v460_v31 }
 0x17d   :  { %v455_v61 = vmax.f32 %v414_v54, 0.0  ;;  %v461_v41 = vmax.f32 %v432_v23, 0.0  ;;  %v547_v54 = vpop.permute.xlu2 %546  ;;  %v596_v57 = vsel %vm580_vm1, %v572_v29, 0.0 }
 0x17f   :  { %v567_v6 = vmul.f32 %v502_v46, %v455_v61  ;;  %v573_v51 = vmul.f32 %v532_v14, %v461_v41 }
 0x181   :  { %v434_v48 = vpop.f32.mrf.mxu2  ;;  %v586_v16 = vsel %vm580_vm1, %v567_v6, 0.0  ;;  %v598_v61 = vsel %vm580_vm1, %v573_v51, 0.0 }
 0x182   :  { %v416_v49 = vpop.f32.mrf.mxu1  ;;  %v587_v27 = vadd.f32 %v586_v16, %v585_v20  ;;  %v435_v35 = vadd.f32 %v434_v48, %v1048_v30  ;;  %v594_v48 = vsel %vm580_vm1, %v571_v40, 0.0 }
 0x183   :  { %v417_v59 = vadd.f32 %v416_v49, %v330_v24 }
 0x184   :  { %v462_v42 = vmax.f32 %v435_v35, 0.0 }
 0x185   :  { %v456_v2 = vmax.f32 %v417_v59, 0.0  ;;  %v562_v10 = vpop.permute.xlu2 %561 }
 0x186   :  { %v574_v58 = vmul.f32 %v537_v45, %v462_v42 }
 0x187   :  { %v568_v11 = vmul.f32 %v507_v52, %v456_v2 }
 0x189   :  { %v437_v62 = vpop.f32.mrf.mxu2  ;;  %v588_v24 = vsel %vm580_vm1, %v568_v11, 0.0 }
 0x18a   :  { %v419_v63 = vpop.f32.mrf.mxu1  ;;  %v589_v38 = vadd.f32 %v588_v24, %v587_v27  ;;  %v438_v43 = vadd.f32 %v437_v62, %v1050_v32  ;;  %v449_v32 = vpop.f32.mrf.mxu3 }
 0x18b   :  { %v420_v3 = vadd.f32 %v419_v63, %v335_v25  ;;  %v450_v60 = vadd.f32 %v449_v32, %v1058_v39 }
 0x18c   :  { %v463_v52 = vmax.f32 %v438_v43, 0.0 }
 0x18d   :  { %v457_v4 = vmax.f32 %v420_v3, 0.0  ;;  %v552_v3 = vpop.permute.xlu0 %551  ;;  %v467_v6 = vmax.f32 %v450_v60, 0.0 }
 0x18e   :  { %v575_v62 = vmul.f32 %v542_v50, %v463_v52 }
 0x18f   :  { %v569_v17 = vmul.f32 %v512_v55, %v457_v4  ;;  %v579_v12 = vmul.f32 %v562_v10, %v467_v6 }
 0x191   :  { %v440_v18 = vpop.f32.mrf.mxu2  ;;  %v590_v36 = vsel %vm580_vm1, %v569_v17, 0.0  ;;  %v610_v17 = vsel %vm580_vm1, %v579_v12, 0.0 }
 0x192   :  { %v422_v21 = vpop.f32.mrf.mxu1  ;;  %v591_v46 = vadd.f32 %v590_v36, %v589_v38  ;;  %v441_v47 = vadd.f32 %v440_v18, %v1052_v33 }
 0x193   :  { %v423_v25 = vadd.f32 %v422_v21, %v1046_v26 }
 0x194   :  { %v464_v33 = vmax.f32 %v441_v47, 0.0 }
 0x195   :  { %v458_v28 = vmax.f32 %v423_v25, 0.0  ;;  %v622_v23 = vpop.permute.xlu0 %621 }
 0x196   :  { %v576_v2 = vmul.f32 %v547_v54, %v464_v33  ;;  %v624_v25 = vperm.slane %v622_v23, 0 }
 0x197   :  { %v570_v44 = vmul.f32 %v517_v56, %v458_v28  ;;  %v447_v56 = vadd.f32 %v446_v19, %v1056_v37  ;;  %v602_v37 = vsel %vm580_vm1, %v575_v62, 0.0 }
 0x198   :  { %v604_v39 = vsel %vm580_vm1, %v576_v2, 0.0 }
 0x199   :  { %v592_v26 = vsel %vm580_vm1, %v570_v44, 0.0  ;;  %v443_v49 = vpop.f32.mrf.mxu2  ;;  %v466_v1 = vmax.f32 %v447_v56, 0.0 }
 0x19a   :  { %v593_v30 = vadd.f32 %v592_v26, %v591_v46  ;;  %v444_v53 = vadd.f32 %v443_v49, %v1054_v34  ;;  %v600_v34 = vsel %vm580_vm1, %v574_v58, 0.0 }
 0x19b   :  { %v578_v9 = vmul.f32 %v557_v7, %v466_v1 }
 0x19c   :  { %v595_v55 = vadd.f32 %v594_v48, %v593_v30  ;;  %v465_v63 = vmax.f32 %v444_v53, 0.0 }
 0x19d   :  { %v608_v15 = vsel %vm580_vm1, %v578_v9, 0.0 }
 0x19e   :  { %v597_v59 = vadd.f32 %v596_v57, %v595_v55  ;;  %v577_v4 = vmul.f32 %v552_v3, %v465_v63 }
 0x1a0   :  { %v599_v0 = vadd.f32 %v598_v61, %v597_v59  ;;  %v606_v13 = vsel %vm580_vm1, %v577_v4, 0.0 }
 0x1a2   :  { %v601_v5 = vadd.f32 %v600_v34, %v599_v0 }
 0x1a4   :  { %v603_v8 = vadd.f32 %v602_v37, %v601_v5 }
 0x1a6   :  { %v605_v11 = vadd.f32 %v604_v39, %v603_v8 }
 0x1a8   :  { %v607_v14 = vadd.f32 %v606_v13, %v605_v11 }
 0x1aa   :  { %v609_v16 = vadd.f32 %v608_v15, %v607_v14 }
 0x1ac   :  { %v611_v18 = vadd.f32 %v610_v17, %v609_v16 }
 0x1ae   :  { %v612_v19 = vrot.slane %v611_v18, 4 }
 0x1b0   :  { %v613_v20 = vadd.f32 %v612_v19, %v611_v18 }
 0x1b2   :  { %v614_v21 = vrot.slane %v613_v20, 2 }
 0x1b4   :  { %v615_v22 = vadd.f32 %v614_v21, %v613_v20 }
 0x1b6   :  { %v616_v24 = vrot.slane %v615_v22, 1 }
 0x1b8   :  { %v617_v27 = vadd.f32 %v616_v24, %v615_v22 }
 0x1ba   :  { %v625_v31 = vadd.f32 %v624_v25, %v617_v27 }
 0x1bc   :  { %627 = vst.msk [vmem:[#allocation3] sm:$0x1] %vm626_vm2, %v625_v31 }
 0x1bd   :  { %638 = dma.vmem_to_hbm [thread:$0]  %s634_s27, 16, %s636_s29, [#allocation4]  }
 0x1be   :  { %723 = dma.done.wait [#allocation4], 16  }
 0x1bf   :  { %724 = vsyncadd [#allocation4], 4294967280 }
 0x1c0   :  { %643 = vsyncpa [#allocation4], 1 }

</bundles_post_ra>
